<compile_context>
chip_gen: v7x
topology: tpu7x:2x2x1
jax: 0.10.0
libtpu: 0.0.40
codegen_flags: <defaults>
</compile_context>

<pallas_src>
import jax
import jax.numpy as jnp
from jax.experimental import pallas as pl
from jax.experimental.pallas import tpu as pltpu

LANE = 128      # lane width of a vreg (last dim)
SUBLANE = 8     # sublane height of a vreg (second-to-last dim)
MAX_TILE_B = 2048


def _round_up(x, m):
    return ((x + m - 1) // m) * m


def mlp_policy_kernel(x_ref,
                      w1_ref, b1_ref,
                      w2_ref, b2_ref,
                      w3_ref, b3_ref,
                      w4_ref, b4_ref,
                      o_ref):
    # MXU operands in bf16, f32 accumulation; bias-add / ReLU on the VPU in f32.
    x = x_ref[...].astype(jnp.bfloat16)

    h = jnp.dot(x, w1_ref[...], preferred_element_type=jnp.float32)
    h = jnp.maximum(h + b1_ref[...], 0.0)

    h = jnp.dot(h.astype(jnp.bfloat16), w2_ref[...], preferred_element_type=jnp.float32)
    h = jnp.maximum(h + b2_ref[...], 0.0)

    h = jnp.dot(h.astype(jnp.bfloat16), w3_ref[...], preferred_element_type=jnp.float32)
    h = jnp.maximum(h + b3_ref[...], 0.0)

    out = jnp.dot(h.astype(jnp.bfloat16), w4_ref[...],
                  preferred_element_type=jnp.float32) + b4_ref[...]
    o_ref[...] = out.astype(o_ref.dtype)


def prepare_params(params):
    """Pad the hidden dim to a lane multiple and cast weights to bf16, ONCE.

    Call this once (e.g. after init / at the top of a rollout) and reuse the
    result for every forward call; the per-call pad/cast passes are gone.
    Input/output feature dims are NOT padded (kept true-width in HBM).
    """
    in_size = params["w1"].shape[0]
    hidden = params["w1"].shape[1]
    action_size = params["w4"].shape[1]
    h_p = _round_up(hidden, LANE)

    def pad2(a, r, c, dtype):
        return jnp.zeros((r, c), dtype).at[:a.shape[0], :a.shape[1]].set(a.astype(dtype))

    return {
        "w1": pad2(params["w1"], in_size, h_p, jnp.bfloat16),
        "b1": pad2(params["b1"], 1, h_p, jnp.float32),
        "w2": pad2(params["w2"], h_p, h_p, jnp.bfloat16),
        "b2": pad2(params["b2"], 1, h_p, jnp.float32),
        "w3": pad2(params["w3"], h_p, h_p, jnp.bfloat16),
        "b3": pad2(params["b3"], 1, h_p, jnp.float32),
        "w4": pad2(params["w4"], h_p, action_size, jnp.bfloat16),
        "b4": pad2(params["b4"], 1, action_size, jnp.float32),
    }


def _choose_tile_b(B):
    """8-aligned batch tile; >=2 grid steps for B>8 (v7x megacore), <=2048 rows."""
    if B <= SUBLANE:
        return SUBLANE
    nb = max(2, pl.cdiv(B, MAX_TILE_B))
    return min(_round_up(pl.cdiv(B, nb), SUBLANE), MAX_TILE_B)


def mlp_policy_forward(x, prepared, *, tile_b=None):
    """x: (B, input_size) float32; prepared: output of prepare_params()."""
    B, in_size = x.shape
    h_p = prepared["w2"].shape[0]
    action_size = prepared["w4"].shape[1]

    if tile_b is None:
        tile_b = _choose_tile_b(B)
    tile_b = max(SUBLANE, _round_up(tile_b, SUBLANE))
    nb = pl.cdiv(B, tile_b)
    b_pad = nb * tile_b

    x = x.astype(jnp.float32)
    xp = x if b_pad == B else jnp.pad(x, ((0, b_pad - B), (0, 0)))

    # Weights/biases stay VMEM-resident across the whole batch grid.
    resident = lambda a: pl.BlockSpec(a.shape, lambda i: (0, 0))

    # Advisory cost estimate (unpadded x/out, bf16 weights, f32 biases).
    flops = 2 * b_pad * (in_size * h_p + 2 * h_p * h_p + h_p * action_size)
    bytes_accessed = (4 * b_pad * (in_size + action_size)
                      + 2 * (in_size * h_p + 2 * h_p * h_p + h_p * action_size)
                      + 4 * (3 * h_p + action_size))

    # VMEM budget: resident bf16 weights + f32 biases, double-buffered x/out
    # tiles, f32 activation temporaries; 2x headroom, clamped to the
    # v7x-safe scoped default (32 MiB).
    vmem_needed = (2 * (in_size * h_p + 2 * h_p * h_p + h_p * action_size)
                   + 4 * (3 * h_p + action_size)
                   + 2 * 4 * tile_b * in_size
                   + 2 * 4 * tile_b * action_size
                   + 4 * 4 * tile_b * h_p)
    vmem_limit = int(min(max(2 * vmem_needed, 8 << 20), 32 << 20))

    out_padded = pl.pallas_call(
        mlp_policy_kernel,
        out_shape=jax.ShapeDtypeStruct((b_pad, action_size), jnp.float32),
        grid=(nb,),
        in_specs=[
            pl.BlockSpec((tile_b, in_size), lambda i: (i, 0)),   # true-width x stream
            resident(prepared["w1"]), resident(prepared["b1"]),
            resident(prepared["w2"]), resident(prepared["b2"]),
            resident(prepared["w3"]), resident(prepared["b3"]),
            resident(prepared["w4"]), resident(prepared["b4"]),
        ],
        out_specs=pl.BlockSpec((tile_b, action_size), lambda i: (i, 0)),
        compiler_params=pltpu.CompilerParams(
            dimension_semantics=("parallel",),   # shards batch tiles across v7x's 2 TCs
            vmem_limit_bytes=vmem_limit),
        cost_estimate=pl.CostEstimate(
            flops=flops, transcendentals=0, bytes_accessed=bytes_accessed),
    )(xp,
      prepared["w1"], prepared["b1"],
      prepared["w2"], prepared["b2"],
      prepared["w3"], prepared["b3"],
      prepared["w4"], prepared["b4"])

    return out_padded if b_pad == B else out_padded[:B]


def init_params(key, input_size, hidden_dim, action_size):
    """Deterministic init mimicking nn.Linear's U(-1/sqrt(fan_in), 1/sqrt(fan_in)).
    Weights stored as (in, out); biases as (1, out)."""
    dims = [(input_size, hidden_dim),
            (hidden_dim, hidden_dim),
            (hidden_dim, hidden_dim),
            (hidden_dim, action_size)]
    params = {}
    keys = jax.random.split(key, 2 * len(dims))
    for i, (fan_in, fan_out) in enumerate(dims):
        bound = 1.0 / jnp.sqrt(jnp.float32(fan_in))
        params[f"w{i+1}"] = jax.random.uniform(
            keys[2 * i], (fan_in, fan_out), jnp.float32, -bound, bound)
        params[f"b{i+1}"] = jax.random.uniform(
            keys[2 * i + 1], (1, fan_out), jnp.float32, -bound, bound)
    return params


def mlp_policy_ref(x, params):
    """Pure-JAX f32 reference for correctness checking."""
    h = jnp.maximum(x @ params["w1"] + params["b1"], 0.0)
    h = jnp.maximum(h @ params["w2"] + params["b2"], 0.0)
    h = jnp.maximum(h @ params["w3"] + params["b3"], 0.0)
    return h @ params["w4"] + params["b4"]


if __name__ == "__main__":
    input_size = 16
    hidden_dim = 32
    action_size = 4

    key = jax.random.PRNGKey(0)
    kx, kp, kx2 = jax.random.split(key, 3)
    params = init_params(kp, input_size, hidden_dim, action_size)
    prepared = prepare_params(params)   # pad + bf16-cast weights ONCE, reused below

    # bf16 MXU operands (f32 accumulate) -> compare to the f32 reference loosely.
    ATOL = RTOL = 2e-2

    # Case 1: small batch (single grid step, auto tile_b).
    batch = 8
    x = jax.random.normal(kx, (batch, input_size), jnp.float32)
    out = jax.block_until_ready(mlp_policy_forward(x, prepared))
    ref = mlp_policy_ref(x, params)
    assert out.shape == (batch, action_size)
    assert jnp.allclose(out, ref, atol=ATOL, rtol=RTOL), "mismatch vs reference (case 1)"

    # Case 2: non-tile-aligned batch with a multi-step (parallel) grid.
    batch2 = 70
    x2 = jax.random.normal(kx2, (batch2, input_size), jnp.float32)
    out2 = jax.block_until_ready(mlp_policy_forward(x2, prepared))
    ref2 = mlp_policy_ref(x2, params)
    assert out2.shape == (batch2, action_size)
    assert jnp.allclose(out2, ref2, atol=ATOL, rtol=RTOL), "mismatch vs reference (case 2)"

    # Case 3: explicit small tile (exercises several grid steps on the same params).
    out3 = jax.block_until_ready(mlp_policy_forward(x2, prepared, tile_b=16))
    assert jnp.allclose(out3, ref2, atol=ATOL, rtol=RTOL), "mismatch vs reference (case 3)"

    print("KERNEL_OK")
</pallas_src>

<mosaic_0001>
module attributes {stable_mosaic.version = 11 : i64} {
  func.func @mlp_policy_kernel(%arg0: i32, %arg1: memref<8x16xf32, #tpu.memory_space<vmem>>, %arg2: memref<16x128xbf16, #tpu.memory_space<vmem>>, %arg3: memref<1x128xf32, #tpu.memory_space<vmem>>, %arg4: memref<128x128xbf16, #tpu.memory_space<vmem>>, %arg5: memref<1x128xf32, #tpu.memory_space<vmem>>, %arg6: memref<128x128xbf16, #tpu.memory_space<vmem>>, %arg7: memref<1x128xf32, #tpu.memory_space<vmem>>, %arg8: memref<128x4xbf16, #tpu.memory_space<vmem>>, %arg9: memref<1x4xf32, #tpu.memory_space<vmem>>, %arg10: memref<8x4xf32, #tpu.memory_space<vmem>>) attributes {dimension_semantics = [#tpu.dimension_semantics<parallel>], iteration_bounds = array<i64: 1>, scalar_prefetch = 0 : i64, scratch_operands = 0 : i64, tpu.core_type = #tpu.core_type<tc>, window_params = [{transform_indices = @transform_0, window_bounds = array<i64: 8, 16>}, {pipeline_mode = #tpu.pipeline_mode<synchronous>, transform_indices = @transform_1, window_bounds = array<i64: 16, 128>}, {pipeline_mode = #tpu.pipeline_mode<synchronous>, transform_indices = @transform_2, window_bounds = array<i64: 1, 128>}, {pipeline_mode = #tpu.pipeline_mode<synchronous>, transform_indices = @transform_3, window_bounds = array<i64: 128, 128>}, {pipeline_mode = #tpu.pipeline_mode<synchronous>, transform_indices = @transform_4, window_bounds = array<i64: 1, 128>}, {pipeline_mode = #tpu.pipeline_mode<synchronous>, transform_indices = @transform_5, window_bounds = array<i64: 128, 128>}, {pipeline_mode = #tpu.pipeline_mode<synchronous>, transform_indices = @transform_6, window_bounds = array<i64: 1, 128>}, {pipeline_mode = #tpu.pipeline_mode<synchronous>, transform_indices = @transform_7, window_bounds = array<i64: 128, 4>}, {pipeline_mode = #tpu.pipeline_mode<synchronous>, transform_indices = @transform_8, window_bounds = array<i64: 1, 4>}, {transform_indices = @transform_9, window_bounds = array<i64: 8, 4>}]} {
    %c0 = arith.constant 0 : index
    %c0_0 = arith.constant 0 : index
    %0 = vector.load %arg1[%c0, %c0_0] : memref<8x16xf32, #tpu.memory_space<vmem>>, vector<8x16xf32>
    %1 = arith.truncf %0 : vector<8x16xf32> to vector<8x16xbf16>
    %c0_1 = arith.constant 0 : index
    %c0_2 = arith.constant 0 : index
    %2 = vector.load %arg2[%c0_1, %c0_2] : memref<16x128xbf16, #tpu.memory_space<vmem>>, vector<16x128xbf16>
    %cst = arith.constant dense<0.000000e+00> : vector<8x128xf32>
    %3 = tpu.matmul %1, %2, %cst {dimension_numbers = #tpu.dot_dimension_numbers<[1], [0], [0], [1], [0, 0, 1, 1], [], []>} : vector<8x16xbf16>, vector<16x128xbf16>, vector<8x128xf32> -> vector<8x128xf32>
    %c0_3 = arith.constant 0 : index
    %c0_4 = arith.constant 0 : index
    %4 = vector.load %arg3[%c0_3, %c0_4] : memref<1x128xf32, #tpu.memory_space<vmem>>, vector<1x128xf32>
    %5 = vector.broadcast %4 : vector<1x128xf32> to vector<8x128xf32>
    %6 = arith.addf %3, %5 : vector<8x128xf32>
    %cst_5 = arith.constant 0.000000e+00 : f32
    %7 = vector.broadcast %cst_5 : f32 to vector<8x128xf32>
    %8 = arith.maximumf %6, %7 : vector<8x128xf32>
    %9 = arith.truncf %8 : vector<8x128xf32> to vector<8x128xbf16>
    %c0_6 = arith.constant 0 : index
    %c0_7 = arith.constant 0 : index
    %10 = vector.load %arg4[%c0_6, %c0_7] : memref<128x128xbf16, #tpu.memory_space<vmem>>, vector<128x128xbf16>
    %cst_8 = arith.constant dense<0.000000e+00> : vector<8x128xf32>
    %11 = tpu.matmul %9, %10, %cst_8 {dimension_numbers = #tpu.dot_dimension_numbers<[1], [0], [0], [1], [0, 0, 1, 1], [], []>} : vector<8x128xbf16>, vector<128x128xbf16>, vector<8x128xf32> -> vector<8x128xf32>
    %c0_9 = arith.constant 0 : index
    %c0_10 = arith.constant 0 : index
    %12 = vector.load %arg5[%c0_9, %c0_10] : memref<1x128xf32, #tpu.memory_space<vmem>>, vector<1x128xf32>
    %13 = vector.broadcast %12 : vector<1x128xf32> to vector<8x128xf32>
    %14 = arith.addf %11, %13 : vector<8x128xf32>
    %cst_11 = arith.constant 0.000000e+00 : f32
    %15 = vector.broadcast %cst_11 : f32 to vector<8x128xf32>
    %16 = arith.maximumf %14, %15 : vector<8x128xf32>
    %17 = arith.truncf %16 : vector<8x128xf32> to vector<8x128xbf16>
    %c0_12 = arith.constant 0 : index
    %c0_13 = arith.constant 0 : index
    %18 = vector.load %arg6[%c0_12, %c0_13] : memref<128x128xbf16, #tpu.memory_space<vmem>>, vector<128x128xbf16>
    %cst_14 = arith.constant dense<0.000000e+00> : vector<8x128xf32>
    %19 = tpu.matmul %17, %18, %cst_14 {dimension_numbers = #tpu.dot_dimension_numbers<[1], [0], [0], [1], [0, 0, 1, 1], [], []>} : vector<8x128xbf16>, vector<128x128xbf16>, vector<8x128xf32> -> vector<8x128xf32>
    %c0_15 = arith.constant 0 : index
    %c0_16 = arith.constant 0 : index
    %20 = vector.load %arg7[%c0_15, %c0_16] : memref<1x128xf32, #tpu.memory_space<vmem>>, vector<1x128xf32>
    %21 = vector.broadcast %20 : vector<1x128xf32> to vector<8x128xf32>
    %22 = arith.addf %19, %21 : vector<8x128xf32>
    %cst_17 = arith.constant 0.000000e+00 : f32
    %23 = vector.broadcast %cst_17 : f32 to vector<8x128xf32>
    %24 = arith.maximumf %22, %23 : vector<8x128xf32>
    %25 = arith.truncf %24 : vector<8x128xf32> to vector<8x128xbf16>
    %c0_18 = arith.constant 0 : index
    %c0_19 = arith.constant 0 : index
    %26 = vector.load %arg8[%c0_18, %c0_19] : memref<128x4xbf16, #tpu.memory_space<vmem>>, vector<128x4xbf16>
    %cst_20 = arith.constant dense<0.000000e+00> : vector<8x4xf32>
    %27 = tpu.matmul %25, %26, %cst_20 {dimension_numbers = #tpu.dot_dimension_numbers<[1], [0], [0], [1], [0, 0, 1, 1], [], []>} : vector<8x128xbf16>, vector<128x4xbf16>, vector<8x4xf32> -> vector<8x4xf32>
    %c0_21 = arith.constant 0 : index
    %c0_22 = arith.constant 0 : index
    %28 = vector.load %arg9[%c0_21, %c0_22] : memref<1x4xf32, #tpu.memory_space<vmem>>, vector<1x4xf32>
    %29 = vector.broadcast %28 : vector<1x4xf32> to vector<8x4xf32>
    %30 = arith.addf %27, %29 : vector<8x4xf32>
    %c0_23 = arith.constant 0 : index
    %c0_24 = arith.constant 0 : index
    %31 = vector.load %arg10[%c0_23, %c0_24] : memref<8x4xf32, #tpu.memory_space<vmem>>, vector<8x4xf32>
    tpu.vector_store %arg10[%c0_23, %c0_24], %30 {strides = array<i32>} : memref<8x4xf32, #tpu.memory_space<vmem>>, vector<8x4xf32>,
    return
  }
  func.func @transform_0(%arg0: i32) -> (i32, i32) {
    %c0_i32 = arith.constant 0 : i32
    %c0_i32_0 = arith.constant 0 : i32
    return %arg0, %c0_i32 : i32, i32
  }
  func.func @transform_1(%arg0: i32) -> (i32, i32) {
    %c0_i32 = arith.constant 0 : i32
    %c0_i32_0 = arith.constant 0 : i32
    %c0_i32_1 = arith.constant 0 : i32
    return %c0_i32, %c0_i32_0 : i32, i32
  }
  func.func @transform_2(%arg0: i32) -> (i32, i32) {
    %c0_i32 = arith.constant 0 : i32
    %c0_i32_0 = arith.constant 0 : i32
    %c0_i32_1 = arith.constant 0 : i32
    return %c0_i32, %c0_i32_0 : i32, i32
  }
  func.func @transform_3(%arg0: i32) -> (i32, i32) {
    %c0_i32 = arith.constant 0 : i32
    %c0_i32_0 = arith.constant 0 : i32
    %c0_i32_1 = arith.constant 0 : i32
    return %c0_i32, %c0_i32_0 : i32, i32
  }
  func.func @transform_4(%arg0: i32) -> (i32, i32) {
    %c0_i32 = arith.constant 0 : i32
    %c0_i32_0 = arith.constant 0 : i32
    %c0_i32_1 = arith.constant 0 : i32
    return %c0_i32, %c0_i32_0 : i32, i32
  }
  func.func @transform_5(%arg0: i32) -> (i32, i32) {
    %c0_i32 = arith.constant 0 : i32
    %c0_i32_0 = arith.constant 0 : i32
    %c0_i32_1 = arith.constant 0 : i32
    return %c0_i32, %c0_i32_0 : i32, i32
  }
  func.func @transform_6(%arg0: i32) -> (i32, i32) {
    %c0_i32 = arith.constant 0 : i32
    %c0_i32_0 = arith.constant 0 : i32
    %c0_i32_1 = arith.constant 0 : i32
    return %c0_i32, %c0_i32_0 : i32, i32
  }
  func.func @transform_7(%arg0: i32) -> (i32, i32) {
    %c0_i32 = arith.constant 0 : i32
    %c0_i32_0 = arith.constant 0 : i32
    %c0_i32_1 = arith.constant 0 : i32
    return %c0_i32, %c0_i32_0 : i32, i32
  }
  func.func @transform_8(%arg0: i32) -> (i32, i32) {
    %c0_i32 = arith.constant 0 : i32
    %c0_i32_0 = arith.constant 0 : i32
    %c0_i32_1 = arith.constant 0 : i32
    return %c0_i32, %c0_i32_0 : i32, i32
  }
  func.func @transform_9(%arg0: i32) -> (i32, i32) {
    %c0_i32 = arith.constant 0 : i32
    %c0_i32_0 = arith.constant 0 : i32
    return %arg0, %c0_i32 : i32, i32
  }
}

</mosaic_0001>

<bundles_post_ra>
// kernel: tpu_custom_call.1
= control target key start
LH: loop header
LB: loop body
LE: loop exit
PB: predicated region body
PF: predicated region fallthrough
CT: control target
= control target key end

     0   :  { %14 = vsyncpa [#allocation3], 0  ;;  %s852_s0 = inlined_call_operand.vmem [shape: f32[8,16], index: 0, kind: input, shape index: {}]   ;;  %s853_s1 = inlined_call_operand.hbm [shape: bf16[16,128], index: 1, kind: input, shape index: {}]   ;;  %s854_s2 = inlined_call_operand.vmem [shape: f32[1,128], index: 2, kind: input, shape index: {}]   ;;  %s855_s3 = inlined_call_operand.vmem [shape: bf16[128,128], index: 3, kind: input, shape index: {}]   ;;  %s856_s4 = inlined_call_operand.vmem [shape: f32[1,128], index: 4, kind: input, shape index: {}]   ;;  %s857_s5 = inlined_call_operand.hbm [shape: bf16[128,128], index: 5, kind: input, shape index: {}]   ;;  %s858_s6 = inlined_call_operand.vmem [shape: f32[1,128], index: 6, kind: input, shape index: {}]   ;;  %s859_s7 = inlined_call_operand.vmem [shape: bf16[128,4], index: 7, kind: input, shape index: {}]   ;;  %s860_s8 = inlined_call_operand.vmem [shape: f32[1,4], index: 8, kind: input, shape index: {}]   ;;  %s861_s9 = inlined_call_operand.vmem [shape: f32[8,4], index: 9, kind: output, shape index: {}]  }
   0x1   :  { %15 = vsyncpa [#allocation5], 0  ;;  %s673_s30 = smov [#allocation2]   ;;  %s625_s13 = scalar_lea.hbm %s853_s1, 128 }
   0x2   :  { %s23_s10 = sshll.u32 %s673_s30, 4  ;;  %p626_p0 = scmp.ne.s32.totalorder %s853_s1, %s625_s13  ;;  %s24_s10 = int_to_ptr.vmem [resolvable:$true] %s23_s10 }
   0x3   :  { %p629_p1 = scmp.lt.u32.totalorder %s625_s13, %s853_s1 }
   0x5   :  { %p631_p2 = pnand %p629_p1, %p626_p0 }
   0x7   :  { %634 = shalt.err (!%p631_p2)
}
   0x8   :  { %s635_s18 = scalar_lea.vmem %s24_s10, 128  ;;  %p640_p4 = scmp.lt.s32.totalorder %s24_s10, %s24_s10 }
   0x9   :  { %p636_p3 = scmp.ne.s32.totalorder %s24_s10, %s635_s18  ;;  %p641_p5 = scmp.lt.s32.totalorder %s635_s18, %s635_s18 }
   0xb   :  { %p642_p6 = por %p641_p5, %p640_p4 }
   0xd   :  { %p643_p7 = pnand %p642_p6, %p636_p3 }
   0xf   :  { %646 = shalt.err (!%p643_p7)
}
  0x10   :  { %s674_s19 = smov 64   ;;  %s675_s20 = smov 4  }
  0x11   :  { %29 = dma.hbm_to_vmem [thread:$0]  %s853_s1, 128, %s24_s10, [#allocation3], %s674_s19, %s674_s19, %s675_s20  }
  0x12   :  { %s676_s23 = smov [#allocation4]   ;;  %s647_s27 = scalar_lea.hbm %s857_s5, 1024 }
  0x13   :  { %s41_s24 = sshll.u32 %s676_s23, 4  ;;  %p648_p8 = scmp.ne.s32.totalorder %s857_s5, %s647_s27  ;;  %s42_s24 = int_to_ptr.vmem [resolvable:$true] %s41_s24 }
  0x14   :  { %p651_p9 = scmp.lt.u32.totalorder %s647_s27, %s857_s5 }
  0x16   :  { %p653_p10 = pnand %p651_p9, %p648_p8 }
  0x18   :  { %656 = shalt.err (!%p653_p10)
}
  0x19   :  { %s657_s12 = scalar_lea.vmem %s42_s24, 1024  ;;  %p662_p12 = scmp.lt.s32.totalorder %s42_s24, %s42_s24 }
  0x1a   :  { %p658_p11 = scmp.ne.s32.totalorder %s42_s24, %s657_s12  ;;  %p663_p13 = scmp.lt.s32.totalorder %s657_s12, %s657_s12 }
  0x1c   :  { %p664_p0 = por %p663_p13, %p662_p12 }
  0x1e   :  { %p665_p1 = pnand %p664_p0, %p658_p11 }
  0x20   :  { %668 = shalt.err (!%p665_p1)
}
  0x21   :  { %47 = dma.hbm_to_vmem [thread:$0]  %s857_s5, 1024, %s42_s24, [#allocation5], %s674_s19, %s674_s19, %s675_s20  }
  0x22   :  { %669 = dma.done.wait [#allocation3], 128  }
  0x23   :  { %670 = vsyncadd [#allocation3], 4294967168 }
  0x24   :  { %671 = dma.done.wait [#allocation5], 1024  }
  0x25   :  { %672 = vsyncadd [#allocation5], 4294966272  ;;  %v677_v0 = vmov 0.0   ;;  %vm678_vm0 = vmmov 0   ;;  %v600_v1 = vld [vmem:[#allocation2] sm:$0xff]   ;;  %vm78_vm1 = vcmask 130048  }
  0x26   :  { %528 = vmatprep.subr.bf16.mxu0 %v677_v0  ;;  %530 = vmatprep.mubr.msk.bf16.mxu0 %vm678_vm0, %v677_v0  ;;  %v61_v2 = vld [vmem:[%s852_s0] sm:$0xff]  ;;  %v602_v5 = vld [vmem:[%s855_s3 + $0x8] sm:$0xff]   ;;  %v603_v6 = vld [vmem:[%s855_s3 + $0x10] sm:$0xff]   ;;  %vm461_vm2 = vcmask 31744  }
  0x27   :  { %534 = vmatprep.subr.bf16.mxu1 %v677_v0  ;;  %550 = vmatprep.mubr.msk.bf16.mxu1 %vm678_vm0, %v677_v0  ;;  %v62_v3 = vpack.c.bf16 %v61_v2, %v61_v2  ;;  %v601_v4 = vld [vmem:[%s855_s3] sm:$0xff]   ;;  %v604_v7 = vld [vmem:[%s855_s3 + $0x18] sm:$0xff]   ;;  %v606_v9 = vld [vmem:[%s855_s3 + $0x28] sm:$0xff]  }
  0x28   :  { %529 = vmatpush3.bf16.msra.mxu0 %v600_v1  ;;  %535 = vmatpush3.bf16.msra.mxu1 %v601_v4  ;;  %v605_v8 = vld [vmem:[%s855_s3 + $0x20] sm:$0xff]   ;;  %v607_v10 = vld [vmem:[%s855_s3 + $0x30] sm:$0xff]   ;;  %v608_v11 = vld [vmem:[%s855_s3 + $0x38] sm:$0xff]  }
  0x29   :  { %554 = vmatprep.subr.bf16.mxu0 %v677_v0  ;;  %536 = vmatprep.subr.bf16.mxu1 %v677_v0  ;;  %v609_v12 = vld [vmem:[#allocation4] sm:$0xff]   ;;  %v610_v13 = vld [vmem:[#allocation4 + $0x8] sm:$0xff]   ;;  %v611_v14 = vld [vmem:[#allocation4 + $0x10] sm:$0xff]  }
  0x2a   :  { %v612_v15 = vld [vmem:[#allocation4 + $0x18] sm:$0xff]   ;;  %v613_v16 = vld [vmem:[#allocation4 + $0x20] sm:$0xff]   ;;  %v614_v17 = vld [vmem:[#allocation4 + $0x28] sm:$0xff]  }
  0x2b   :  { %531 = vmatmul.mubr.msk.bf16.vlgmr.msra.gmra.mrb[0].mxu0 %vm78_vm1, %v62_v3  ;;  %v469_v18 = vld [vmem:[%s854_s2] ss:$0 sm:$0xff]  ;;  %v615_v26 = vld [vmem:[#allocation4 + $0x30] sm:$0xff]   ;;  %v618_v29 = vld [vmem:[%s859_s7 + $0x8] sm:$0xff]  }
  0x2c   :  { %570 = vmatprep.mubr.msk.bf16.mxu0 %vm678_vm0, %v677_v0  ;;  %537 = vmatpush3.bf16.msra.mxu1 %v602_v5  ;;  %v616_v27 = vld [vmem:[#allocation4 + $0x38] sm:$0xff]   ;;  %v619_v30 = vld [vmem:[%s859_s7 + $0x10] sm:$0xff]   ;;  %v620_v31 = vld [vmem:[%s859_s7 + $0x18] sm:$0xff]  }
  0x2d   :  { %538 = vmatprep.subr.bf16.mxu1 %v677_v0  ;;  %555 = vmatpush3.bf16.msra.mxu0 %v609_v12  ;;  %v617_v28 = vld [vmem:[%s859_s7] sm:$0xff]   ;;  %v622_v33 = vld [vmem:[%s859_s7 + $0x28] sm:$0xff]   ;;  %v623_v42 = vld [vmem:[%s859_s7 + $0x30] sm:$0xff]  }
  0x2e   :  { %556 = vmatprep.subr.bf16.mxu0 %v677_v0  ;;  %v621_v32 = vld [vmem:[%s859_s7 + $0x20] sm:$0xff]   ;;  %v624_v43 = vld [vmem:[%s859_s7 + $0x38] sm:$0xff]  }
  0x2f   :  { %v472_v34 = vld [vmem:[%s856_s4] ss:$0 sm:$0xff] }
  0x30   :  { %539 = vmatpush3.bf16.msra.mxu1 %v603_v6  ;;  %v481_v44 = vld [vmem:[%s858_s6] ss:$0 sm:$0xff] }
  0x31   :  { %540 = vmatprep.subr.bf16.mxu1 %v677_v0  ;;  %557 = vmatpush3.bf16.msra.mxu0 %v610_v13  ;;  %v490_v52 = vld [vmem:[%s860_s8] ss:$0 sm:$0xff] }
  0x32   :  { %558 = vmatprep.subr.bf16.mxu0 %v677_v0 }
  0x34   :  { %541 = vmatpush3.bf16.msra.mxu1 %v604_v7 }
  0x35   :  { %542 = vmatprep.subr.bf16.mxu1 %v677_v0  ;;  %559 = vmatpush3.bf16.msra.mxu0 %v611_v14 }
  0x36   :  { %560 = vmatprep.subr.bf16.mxu0 %v677_v0 }
  0x38   :  { %543 = vmatpush3.bf16.msra.mxu1 %v605_v8 }
  0x39   :  { %544 = vmatprep.subr.bf16.mxu1 %v677_v0  ;;  %561 = vmatpush3.bf16.msra.mxu0 %v612_v15 }
  0x3a   :  { %562 = vmatprep.subr.bf16.mxu0 %v677_v0 }
  0x3c   :  { %545 = vmatpush3.bf16.msra.mxu1 %v606_v9 }
  0x3d   :  { %546 = vmatprep.subr.bf16.mxu1 %v677_v0  ;;  %563 = vmatpush3.bf16.msra.mxu0 %v613_v16 }
  0x3e   :  { %564 = vmatprep.subr.bf16.mxu0 %v677_v0 }
  0x40   :  { %547 = vmatpush3.bf16.msra.mxu1 %v607_v10 }
  0x41   :  { %548 = vmatprep.subr.bf16.mxu1 %v677_v0  ;;  %565 = vmatpush3.bf16.msra.mxu0 %v614_v17 }
  0x42   :  { %566 = vmatprep.subr.bf16.mxu0 %v677_v0 }
  0x44   :  { %549 = vmatpush3.bf16.msra.mxu1 %v608_v11 }
  0x45   :  { %574 = vmatprep.subr.bf16.mxu1 %v677_v0  ;;  %567 = vmatpush3.bf16.msra.mxu0 %v615_v26 }
  0x46   :  { %568 = vmatprep.subr.bf16.mxu0 %v677_v0 }
  0x49   :  { %569 = vmatpush3.bf16.msra.mxu0 %v616_v27 }
  0xfe   :  { %v116_v19 = vpop.f32.mrb[0].mxu0 }
  0xff   :  { %v117_v20 = vadd.f32 %v469_v18, %v116_v19  ;;  %v532_v21 = vpop.f32.mrb[1].mxu0 }
 0x100   :  { %v119_v22 = vpop.f32.mrb[2].mxu0 }
 0x101   :  { %v122_v23 = vmax.f32 %v117_v20, 0.0  ;;  %v533_v24 = vpop.f32.mrb[3].mxu0 }
 0x103   :  { %v123_v25 = vpack.c.bf16 %v122_v23, %v122_v23 }
 0x105   :  { %551 = vmatmul.mubr.bf16.vlgmr.msra.gmra.mrb[0].mxu1 %v123_v25 }
 0x106   :  { %590 = vmatprep.mubr.msk.bf16.mxu1 %vm678_vm0, %v677_v0  ;;  %575 = vmatpush3.bf16.msra.mxu1 %v617_v28 }
 0x107   :  { %576 = vmatprep.subr.bf16.mxu1 %v677_v0 }
 0x10a   :  { %577 = vmatpush3.bf16.msra.mxu1 %v618_v29 }
 0x10b   :  { %578 = vmatprep.subr.bf16.mxu1 %v677_v0 }
 0x10e   :  { %579 = vmatpush3.bf16.msra.mxu1 %v619_v30 }
 0x10f   :  { %580 = vmatprep.subr.bf16.mxu1 %v677_v0 }
 0x112   :  { %581 = vmatpush3.bf16.msra.mxu1 %v620_v31 }
 0x113   :  { %582 = vmatprep.subr.bf16.mxu1 %v677_v0 }
 0x116   :  { %583 = vmatpush3.bf16.msra.mxu1 %v621_v32 }
 0x117   :  { %584 = vmatprep.subr.bf16.mxu1 %v677_v0 }
 0x11a   :  { %585 = vmatpush3.bf16.msra.mxu1 %v622_v33 }
 0x11b   :  { %586 = vmatprep.subr.bf16.mxu1 %v677_v0 }
 0x11e   :  { %587 = vmatpush3.bf16.msra.mxu1 %v623_v42 }
 0x11f   :  { %588 = vmatprep.subr.bf16.mxu1 %v677_v0 }
 0x122   :  { %589 = vmatpush3.bf16.msra.mxu1 %v624_v43 }
 0x1d8   :  { %v229_v35 = vpop.f32.mrb[0].mxu1 }
 0x1d9   :  { %v230_v36 = vadd.f32 %v472_v34, %v229_v35  ;;  %v552_v37 = vpop.f32.mrb[1].mxu1 }
 0x1da   :  { %v232_v38 = vpop.f32.mrb[2].mxu1 }
 0x1db   :  { %v235_v39 = vmax.f32 %v230_v36, 0.0  ;;  %v553_v40 = vpop.f32.mrb[3].mxu1 }
 0x1dd   :  { %v236_v41 = vpack.c.bf16 %v235_v39, %v235_v39 }
 0x1df   :  { %571 = vmatmul.mubr.bf16.vlgmr.msra.gmra.mrb[4].mxu0 %v236_v41 }
 0x2b2   :  { %v342_v45 = vpop.f32.mrb[4].mxu0 }
 0x2b3   :  { %v343_v46 = vadd.f32 %v481_v44, %v342_v45  ;;  %v572_v47 = vpop.f32.mrb[5].mxu0 }
 0x2b4   :  { %v345_v48 = vpop.f32.mrb[6].mxu0 }
 0x2b5   :  { %v348_v49 = vmax.f32 %v343_v46, 0.0  ;;  %v573_v50 = vpop.f32.mrb[7].mxu0 }
 0x2b7   :  { %v349_v51 = vpack.c.bf16 %v348_v49, %v348_v49 }
 0x2b9   :  { %591 = vmatmul.mubr.bf16.vlgmr.msra.gmra.mrb[4].mxu1 %v349_v51 }
 0x38c   :  { %v455_v53 = vpop.f32.mrb[4].mxu1 }
 0x38d   :  { %v456_v54 = vadd.f32 %v490_v52, %v455_v53  ;;  %v592_v55 = vpop.f32.mrb[5].mxu1 }
 0x38e   :  { %v458_v56 = vpop.f32.mrb[6].mxu1 }
 0x38f   :  { %462 = vst.msk [vmem:[%s861_s9] sm:$0xff] %vm461_vm2, %v456_v54  ;;  %v593_v57 = vpop.f32.mrb[7].mxu1 }
 0x390   :  { %467 = vsyncpa [#allocation3], 1 }
 0x391   :  { %468 = vsyncpa [#allocation5], 1 }

</bundles_post_ra>
